<compile_context>
chip_gen: v5e
topology: v5e:2x2
jax: 0.10.0
libtpu: 0.0.40
codegen_flags: <defaults>
</compile_context>

<pallas_src>
import jax
import jax.numpy as jnp
from jax.experimental import pallas as pl
from jax.experimental.pallas import tpu as pltpu


def _round_up(a, b):
    return (a + b - 1) // b * b


def _recal_kernel(x_ref, m2_ref, b2_ref, e_ref, o_ref):
    # x_ref : (TR, HWp)  lane-dense slab of flattened (H*W) rows
    # m2_ref: (HWp, K)   fused mean + Linear1 + Linear2 "reduce" operator, K = H + W
    # b2_ref: (1, K)     fused bias row
    # e_ref : (K, HWp)   exact 0/1 "expand" (broadcast) operator
    x = x_ref[...]
    # Per-row gate values for both axes; f32 accumulation on the MXU.
    g_small = jnp.dot(x, m2_ref[...], preferred_element_type=jnp.float32) + b2_ref[...]
    # Broadcast both gates back to the flattened (H*W) layout with a tiny matmul,
    # avoiding any in-kernel reshape / lane relayout.
    gate = jnp.dot(g_small, e_ref[...], preferred_element_type=jnp.float32)
    o_ref[...] = (x.astype(jnp.float32) * gate).astype(o_ref.dtype)


def precompute_gate_operators(params, H, W):
    """Fold mean-over-axis + Linear->Linear (no activation) + broadcast into
    (M2, b2, E).  Call once per parameter set (hoisted out of the forward path)."""
    f32 = jnp.float32
    # PyTorch Linear: y = a @ W^T + b, weight stored (out, in).
    Wf = (params["fre_w1"].T @ params["fre_w2"].T).astype(f32)                    # (W, W)
    bf = (params["fre_b1"] @ params["fre_w2"].T + params["fre_b2"]).astype(f32)   # (W,)
    Wc = (params["ch_w1"].T @ params["ch_w2"].T).astype(f32)                      # (H, H)
    bc = (params["ch_b1"] @ params["ch_w2"].T + params["ch_b2"]).astype(f32)      # (H,)

    # gate_f[r, w'] = sum_{h,w} x[r, h*W+w] * Wf[w, w'] / H + bf[w']
    # gate_c[r, h'] = sum_{h,w} x[r, h*W+w] * Wc[h, h'] / W + bc[h']
    M2 = jnp.concatenate(
        [jnp.kron(jnp.ones((H, 1), f32) / H, Wf),      # (HW, W)
         jnp.kron(Wc / W, jnp.ones((W, 1), f32))],     # (HW, H)
        axis=1)                                        # (HW, W+H)
    b2 = jnp.concatenate([bf, bc]).reshape(1, H + W)

    # gate[r, h*W+w] = gate_f[r, w] + gate_c[r, h]
    E = jnp.concatenate(
        [jnp.tile(jnp.eye(W, dtype=f32), (1, H)),       # (W, HW) select w
         jnp.repeat(jnp.eye(H, dtype=f32), W, axis=1)], # (H, HW) select h
        axis=0)                                         # (W+H, HW)
    return M2, b2, E


def recalibration_pallas(x, M2, b2, E, *, row_tile=512):
    """x: (B, C, H, W).  M2/b2/E from precompute_gate_operators (same H, W)."""
    B, C, H, W = x.shape
    HW = H * W
    K = H + W
    R = B * C
    assert M2.shape == (HW, K) and b2.shape == (1, K) and E.shape == (K, HW)

    x2 = x.reshape(R, HW)  # keep native dtype: memory-bound op, no f32 round trip

    # Pad the flattened spatial axis to a multiple of 128 lanes so stores are unmasked.
    HWp = max(128, _round_up(HW, 128))
    if HWp != HW:
        x2 = jnp.pad(x2, ((0, 0), (0, HWp - HW)))
        M2 = jnp.pad(M2, ((0, HWp - HW), (0, 0)))
        E = jnp.pad(E, ((0, 0), (0, HWp - HW)))

    # Row tiling: rows are independent -> "parallel" grid.  Aim for >= 2 grid steps
    # when R allows (v7x megacore sharding + pipeline prefetch), rows multiple of 8.
    if R <= 8:
        TR = R
    else:
        TR = max(8, min(row_tile, _round_up(pl.cdiv(R, 2), 8)))
    grid_r = pl.cdiv(R, TR)

    itemsize = jnp.dtype(x.dtype).itemsize
    vmem_bytes = int(
        2 * 2 * TR * HWp * itemsize          # x / out tiles, double-buffered
        + 2 * 4 * (HWp * K + K * HWp + K)    # M2, E, b2 constants
        + (4 << 20))                         # headroom
    vmem_bytes = min(max(vmem_bytes, 32 << 20), 64 << 20)

    cost = pl.CostEstimate(
        flops=int(4 * R * HWp * K + 3 * R * HWp),
        transcendentals=0,
        bytes_accessed=int(2 * R * HWp * itemsize + 4 * (2 * HWp * K + K)),
    )

    out2 = pl.pallas_call(
        _recal_kernel,
        out_shape=jax.ShapeDtypeStruct((R, HWp), x.dtype),
        grid=(grid_r,),
        in_specs=[
            pl.BlockSpec((TR, HWp), lambda i: (i, 0)),
            pl.BlockSpec((HWp, K), lambda i: (0, 0)),   # constant index_map ->
            pl.BlockSpec((1, K), lambda i: (0, 0)),     # stays VMEM-resident
            pl.BlockSpec((K, HWp), lambda i: (0, 0)),
        ],
        out_specs=pl.BlockSpec((TR, HWp), lambda i: (i, 0)),
        compiler_params=pltpu.CompilerParams(
            dimension_semantics=("parallel",),
            vmem_limit_bytes=vmem_bytes),
        cost_estimate=cost,
    )(x2, M2, b2, E)

    if HWp != HW:
        out2 = out2[:, :HW]
    return out2.reshape(B, C, H, W)


def recalibration_ref(x, params):
    """Pure-JAX reference mirroring the PyTorch forward exactly."""
    fre_avg = jnp.mean(x, axis=2, keepdims=True)                       # (B,C,1,W)
    g = fre_avg @ params["fre_w1"].T + params["fre_b1"]
    g = g @ params["fre_w2"].T + params["fre_b2"]                      # (B,C,1,W)
    x_fre = x * g

    ch_avg = jnp.mean(jnp.swapaxes(x, 2, 3), axis=2, keepdims=True)    # (B,C,1,H)
    h = ch_avg @ params["ch_w1"].T + params["ch_b1"]
    h = h @ params["ch_w2"].T + params["ch_b2"]                        # (B,C,1,H)
    x_ch = x * jnp.swapaxes(h, 2, 3)
    return x_fre + x_ch


def init_params(key, H, W):
    H4, W4 = H // 4, W // 4
    ks = jax.random.split(key, 8)
    s = 0.1
    return {
        "fre_w1": s * jax.random.normal(ks[0], (W4, W), jnp.float32),
        "fre_b1": s * jax.random.normal(ks[1], (W4,), jnp.float32),
        "fre_w2": s * jax.random.normal(ks[2], (W, W4), jnp.float32),
        "fre_b2": s * jax.random.normal(ks[3], (W,), jnp.float32),
        "ch_w1":  s * jax.random.normal(ks[4], (H4, H), jnp.float32),
        "ch_b1":  s * jax.random.normal(ks[5], (H4,), jnp.float32),
        "ch_w2":  s * jax.random.normal(ks[6], (H, H4), jnp.float32),
        "ch_b2":  s * jax.random.normal(ks[7], (H,), jnp.float32),
    }


if __name__ == "__main__":
    B, C, H, W = 2, 4, 16, 16          # img_size = (16, 16)
    key = jax.random.PRNGKey(0)
    kx, kp = jax.random.split(key)
    x = jax.random.normal(kx, (B, C, H, W), jnp.float32)
    params = init_params(kp, H, W)

    # Hoisted: build the fused gate operators once per parameter set.
    M2, b2, E = precompute_gate_operators(params, H, W)

    out = recalibration_pallas(x, M2, b2, E)
    out = jax.block_until_ready(out)

    ref = recalibration_ref(x, params)
    assert out.shape == (B, C, H, W)
    assert jnp.allclose(out, ref, atol=1e-3, rtol=1e-3), float(jnp.max(jnp.abs(out - ref)))
    print("KERNEL_OK")
</pallas_src>

<mosaic_0001>
module attributes {stable_mosaic.version = 11 : i64} {
  func.func @_recal_kernel(%arg0: i32, %arg1: memref<8x256xf32, #tpu.memory_space<vmem>>, %arg2: memref<256x32xf32, #tpu.memory_space<vmem>>, %arg3: memref<1x32xf32, #tpu.memory_space<vmem>>, %arg4: memref<32x256xf32, #tpu.memory_space<vmem>>, %arg5: memref<8x256xf32, #tpu.memory_space<vmem>>) attributes {dimension_semantics = [#tpu.dimension_semantics<parallel>], iteration_bounds = array<i64: 1>, scalar_prefetch = 0 : i64, scratch_operands = 0 : i64, tpu.core_type = #tpu.core_type<tc>, window_params = [{transform_indices = @transform_0, window_bounds = array<i64: 8, 256>}, {pipeline_mode = #tpu.pipeline_mode<synchronous>, transform_indices = @transform_1, window_bounds = array<i64: 256, 32>}, {pipeline_mode = #tpu.pipeline_mode<synchronous>, transform_indices = @transform_2, window_bounds = array<i64: 1, 32>}, {pipeline_mode = #tpu.pipeline_mode<synchronous>, transform_indices = @transform_3, window_bounds = array<i64: 32, 256>}, {transform_indices = @transform_4, window_bounds = array<i64: 8, 256>}]} {
    %c0 = arith.constant 0 : index
    %c0_0 = arith.constant 0 : index
    %0 = vector.load %arg1[%c0, %c0_0] : memref<8x256xf32, #tpu.memory_space<vmem>>, vector<8x256xf32>
    %c0_1 = arith.constant 0 : index
    %c0_2 = arith.constant 0 : index
    %1 = vector.load %arg2[%c0_1, %c0_2] : memref<256x32xf32, #tpu.memory_space<vmem>>, vector<256x32xf32>
    %cst = arith.constant dense<0.000000e+00> : vector<8x32xf32>
    %2 = tpu.matmul %0, %1, %cst {dimension_numbers = #tpu.dot_dimension_numbers<[1], [0], [0], [1], [0, 0, 1, 1], [], []>} : vector<8x256xf32>, vector<256x32xf32>, vector<8x32xf32> -> vector<8x32xf32>
    %c0_3 = arith.constant 0 : index
    %c0_4 = arith.constant 0 : index
    %3 = vector.load %arg3[%c0_3, %c0_4] : memref<1x32xf32, #tpu.memory_space<vmem>>, vector<1x32xf32>
    %4 = vector.broadcast %3 : vector<1x32xf32> to vector<8x32xf32>
    %5 = arith.addf %2, %4 : vector<8x32xf32>
    %c0_5 = arith.constant 0 : index
    %c0_6 = arith.constant 0 : index
    %6 = vector.load %arg4[%c0_5, %c0_6] : memref<32x256xf32, #tpu.memory_space<vmem>>, vector<32x256xf32>
    %cst_7 = arith.constant dense<0.000000e+00> : vector<8x256xf32>
    %7 = tpu.matmul %5, %6, %cst_7 {dimension_numbers = #tpu.dot_dimension_numbers<[1], [0], [0], [1], [0, 0, 1, 1], [], []>} : vector<8x32xf32>, vector<32x256xf32>, vector<8x256xf32> -> vector<8x256xf32>
    %8 = arith.mulf %0, %7 : vector<8x256xf32>
    %c0_8 = arith.constant 0 : index
    %c0_9 = arith.constant 0 : index
    %9 = vector.load %arg5[%c0_8, %c0_9] : memref<8x256xf32, #tpu.memory_space<vmem>>, vector<8x256xf32>
    tpu.vector_store %arg5[%c0_8, %c0_9], %8 {strides = array<i32>} : memref<8x256xf32, #tpu.memory_space<vmem>>, vector<8x256xf32>,
    return
  }
  func.func @transform_0(%arg0: i32) -> (i32, i32) {
    %c0_i32 = arith.constant 0 : i32
    %c0_i32_0 = arith.constant 0 : i32
    return %arg0, %c0_i32 : i32, i32
  }
  func.func @transform_1(%arg0: i32) -> (i32, i32) {
    %c0_i32 = arith.constant 0 : i32
    %c0_i32_0 = arith.constant 0 : i32
    %c0_i32_1 = arith.constant 0 : i32
    return %c0_i32, %c0_i32_0 : i32, i32
  }
  func.func @transform_2(%arg0: i32) -> (i32, i32) {
    %c0_i32 = arith.constant 0 : i32
    %c0_i32_0 = arith.constant 0 : i32
    %c0_i32_1 = arith.constant 0 : i32
    return %c0_i32, %c0_i32_0 : i32, i32
  }
  func.func @transform_3(%arg0: i32) -> (i32, i32) {
    %c0_i32 = arith.constant 0 : i32
    %c0_i32_0 = arith.constant 0 : i32
    %c0_i32_1 = arith.constant 0 : i32
    return %c0_i32, %c0_i32_0 : i32, i32
  }
  func.func @transform_4(%arg0: i32) -> (i32, i32) {
    %c0_i32 = arith.constant 0 : i32
    %c0_i32_0 = arith.constant 0 : i32
    return %arg0, %c0_i32 : i32, i32
  }
}

</mosaic_0001>

<bundles_post_ra>
// kernel: tpu_custom_call.1
= control target key start
LH: loop header
LB: loop body
LE: loop exit
PB: predicated region body
PF: predicated region fallthrough
CT: control target
= control target key end

     0   :  { %s356_s0 = inlined_call_operand.vmem [shape: f32[8,256], index: 0, kind: input, shape index: {}]   ;;  %s357_s1 = inlined_call_operand.vmem [shape: f32[256,32], index: 1, kind: input, shape index: {}]   ;;  %s358_s2 = inlined_call_operand.vmem [shape: f32[1,32], index: 2, kind: input, shape index: {}]   ;;  %s359_s3 = inlined_call_operand.vmem [shape: f32[32,256], index: 3, kind: input, shape index: {}]   ;;  %s360_s4 = inlined_call_operand.hbm [shape: f32[8,256], index: 4, kind: output, shape index: {}]  }
   0x1   :  { %v35_v0 = vld [vmem:[%s357_s1 + $0x78] sm:$0xff]  ;;  %v34_v1 = vld [vmem:[%s357_s1 + $0x70] sm:$0xff]  ;;  %v33_v4 = vld [vmem:[%s357_s1 + $0x68] sm:$0xff] }
   0x2   :  { %v51_v2 = vld [vmem:[%s357_s1 + $0xf8] sm:$0xff]  ;;  %56 = vmatpush.msra.mxu0 %v35_v0  ;;  %v50_v3 = vld [vmem:[%s357_s1 + $0xf0] sm:$0xff]  ;;  %v49_v5 = vld [vmem:[%s357_s1 + $0xe8] sm:$0xff] }
   0x3   :  { %76 = vmatpush.msra.mxu1 %v51_v2  ;;  %v32_v6 = vld [vmem:[%s357_s1 + $0x60] sm:$0xff]  ;;  %v31_v8 = vld [vmem:[%s357_s1 + $0x58] sm:$0xff]  ;;  %v30_v10 = vld [vmem:[%s357_s1 + $0x50] sm:$0xff] }
   0x4   :  { %57 = vmatpush.msra.mxu0 %v34_v1  ;;  %v48_v7 = vld [vmem:[%s357_s1 + $0xe0] sm:$0xff]  ;;  %v47_v9 = vld [vmem:[%s357_s1 + $0xd8] sm:$0xff]  ;;  %v46_v11 = vld [vmem:[%s357_s1 + $0xd0] sm:$0xff] }
   0x5   :  { %77 = vmatpush.msra.mxu1 %v50_v3  ;;  %v29_v12 = vld [vmem:[%s357_s1 + $0x48] sm:$0xff]  ;;  %v28_v14 = vld [vmem:[%s357_s1 + $0x40] sm:$0xff]  ;;  %v102_v15 = vld [vmem:[%s359_s3 + $0x30] sm:$0xff] }
   0x6   :  { %58 = vmatpush.msra.mxu0 %v33_v4  ;;  %v45_v13 = vld [vmem:[%s357_s1 + $0xc8] sm:$0xff]  ;;  %v103_v16 = vld [vmem:[%s359_s3 + $0x38] sm:$0xff]  ;;  %v44_v17 = vld [vmem:[%s357_s1 + $0xc0] sm:$0xff]  ;;  %120 = vmatpush.msra.mxu2 %v102_v15 }
   0x7   :  { %78 = vmatpush.msra.mxu1 %v49_v5  ;;  %140 = vmatpush.msra.mxu3 %v103_v16 }
   0x8   :  { %59 = vmatpush.msra.mxu0 %v32_v6 }
   0x9   :  { %79 = vmatpush.msra.mxu1 %v48_v7 }
   0xa   :  { %60 = vmatpush.msra.mxu0 %v31_v8 }
   0xb   :  { %80 = vmatpush.msra.mxu1 %v47_v9 }
   0xc   :  { %61 = vmatpush.msra.mxu0 %v30_v10 }
   0xd   :  { %81 = vmatpush.msra.mxu1 %v46_v11 }
   0xe   :  { %9 = vsyncpa [#allocation3], 0  ;;  %62 = vmatpush.msra.mxu0 %v29_v12  ;;  %v27_v18 = vld [vmem:[%s357_s1 + $0x38] sm:$0xff]  ;;  %v26_v20 = vld [vmem:[%s357_s1 + $0x30] sm:$0xff]  ;;  %vm104_vm0 = vcmask 261120   ;;  %s198_s21 = smov [#allocation2]  }
   0xf   :  { %82 = vmatpush.msra.mxu1 %v45_v13  ;;  %v43_v19 = vld [vmem:[%s357_s1 + $0xb8] sm:$0xff]  ;;  %v42_v21 = vld [vmem:[%s357_s1 + $0xb0] sm:$0xff]  ;;  %v25_v22 = vld [vmem:[%s357_s1 + $0x28] sm:$0xff]  ;;  %s157_s22 = sshll.u32 %s198_s21, 4  ;;  %s159_s25 = sshll.u32 %s360_s4, 4  ;;  %s158_s22 = int_to_ptr.vmem [resolvable:$true] %s157_s22  ;;  %s160_s25 = int_to_ptr.hbm [resolvable:$true] %s159_s25 }
  0x10   :  { %63 = vmatpush.msra.mxu0 %v28_v14  ;;  %v41_v23 = vld [vmem:[%s357_s1 + $0xa8] sm:$0xff]  ;;  %v24_v24 = vld [vmem:[%s357_s1 + $0x20] sm:$0xff]  ;;  %v23_v26 = vld [vmem:[%s357_s1 + $0x18] sm:$0xff] }
  0x11   :  { %83 = vmatpush.msra.mxu1 %v44_v17  ;;  %v40_v25 = vld [vmem:[%s357_s1 + $0xa0] sm:$0xff]  ;;  %v39_v27 = vld [vmem:[%s357_s1 + $0x98] sm:$0xff]  ;;  %v22_v28 = vld [vmem:[%s357_s1 + $0x10] sm:$0xff] }
  0x12   :  { %64 = vmatpush.msra.mxu0 %v27_v18  ;;  %v38_v29 = vld [vmem:[%s357_s1 + $0x90] sm:$0xff]  ;;  %v21_v30 = vld [vmem:[%s357_s1 + $0x8] sm:$0xff]  ;;  %v20_v32 = vld [vmem:[%s357_s1] sm:$0xff] }
  0x13   :  { %84 = vmatpush.msra.mxu1 %v43_v19  ;;  %v37_v31 = vld [vmem:[%s357_s1 + $0x88] sm:$0xff]  ;;  %v36_v33 = vld [vmem:[%s357_s1 + $0x80] sm:$0xff]  ;;  %v98_v38 = vld [vmem:[%s359_s3 + $0x10] sm:$0xff] }
  0x14   :  { %65 = vmatpush.msra.mxu0 %v26_v20  ;;  %v18_v34 = vld [vmem:[%s356_s0] sm:$0xff]  ;;  %v19_v35 = vld [vmem:[%s356_s0 + $0x8] sm:$0xff]  ;;  %v99_v39 = vld [vmem:[%s359_s3 + $0x18] sm:$0xff] }
  0x15   :  { %85 = vmatpush.msra.mxu1 %v42_v21  ;;  %v100_v36 = vld [vmem:[%s359_s3 + $0x20] sm:$0xff]  ;;  %v101_v37 = vld [vmem:[%s359_s3 + $0x28] sm:$0xff] }
  0x16   :  { %66 = vmatpush.msra.mxu0 %v25_v22  ;;  %121 = vmatpush.msra.mxu2 %v100_v36  ;;  %v96_v40 = vld [vmem:[%s359_s3] sm:$0xff]  ;;  %v97_v41 = vld [vmem:[%s359_s3 + $0x8] sm:$0xff] }
  0x17   :  { %86 = vmatpush.msra.mxu1 %v41_v23  ;;  %141 = vmatpush.msra.mxu3 %v101_v37  ;;  %v171_v42 = vld [vmem:[%s358_s2] ss:$0 sm:$0xff] }
  0x18   :  { %67 = vmatpush.msra.mxu0 %v24_v24  ;;  %122 = vmatpush.msra.mxu2 %v98_v38 }
  0x19   :  { %87 = vmatpush.msra.mxu1 %v40_v25  ;;  %142 = vmatpush.msra.mxu3 %v99_v39 }
  0x1a   :  { %68 = vmatpush.msra.mxu0 %v23_v26  ;;  %123 = vmatpush.msra.mxu2 %v96_v40 }
  0x1b   :  { %88 = vmatpush.msra.mxu1 %v39_v27  ;;  %143 = vmatpush.msra.mxu3 %v97_v41 }
  0x1c   :  { %69 = vmatpush.msra.mxu0 %v22_v28 }
  0x1d   :  { %89 = vmatpush.msra.mxu1 %v38_v29 }
  0x1e   :  { %70 = vmatpush.msra.mxu0 %v21_v30 }
  0x1f   :  { %90 = vmatpush.msra.mxu1 %v37_v31 }
  0x20   :  { %71 = vmatpush.msra.mxu0 %v20_v32 }
  0x21   :  { %91 = vmatpush.msra.mxu1 %v36_v33  ;;  %72 = vmatmul.f32.vlgmr.msra.gmra.mxu0 %v18_v34 }
  0x22   :  { %92 = vmatmul.f32.vlgmr.msra.gmra.mxu1 %v19_v35 }
  0x9e   :  { %v73_v43 = vpop.f32.mrf.mxu0 }
  0x9f   :  { %v93_v44 = vpop.f32.mrf.mxu1  ;;  %v74_v45 = vadd.f32 %v171_v42, %v73_v43 }
  0xa1   :  { %v94_v46 = vadd.f32 %v93_v44, %v74_v45 }
  0xa3   :  { %168 = vmatmul.msk.f32.vlgmr.msra.gmra.mxu2 %vm104_vm0, %v94_v46  ;;  %169 = vmatmul.msk.f32.vlgmr.msra.gmra.mxu3 %vm104_vm0, %v94_v46 }
 0x126   :  { %v125_v47 = vpop.f32.mrf.mxu2  ;;  %v145_v48 = vpop.f32.mrf.mxu3 }
 0x127   :  { %v148_v49 = vmul.f32 %v125_v47, %v18_v34  ;;  %v149_v50 = vmul.f32 %v145_v48, %v19_v35 }
 0x129   :  { %150 = vst [vmem:[#allocation2] sm:$0xff] %v148_v49 }
 0x12a   :  { %151 = vst [vmem:[#allocation2 + $0x8] sm:$0xff] %v149_v50 }
 0x12b   :  { %162 = dma.vmem_to_hbm [thread:$0]  %s158_s22, 256, %s160_s25, [#allocation3]  }
 0x12c   :  { %196 = dma.done.wait [#allocation3], 256  }
 0x12d   :  { %197 = vsyncadd [#allocation3], 4294967040 }
 0x12e   :  { %167 = vsyncpa [#allocation3], 1 }

</bundles_post_ra>
